<compile_context>
chip_gen: v7x
topology: tpu7x:2x2x1
jax: 0.10.0
libtpu: 0.0.40
codegen_flags: <defaults>
</compile_context>

<pallas_src>
import functools

import jax
import jax.numpy as jnp
from jax.experimental import pallas as pl
from jax.experimental.pallas import tpu as pltpu


# -----------------------------------------------------------------------------
# Static shape helpers
# -----------------------------------------------------------------------------
def _round_up(x, m):
    return ((x + m - 1) // m) * m


def _batch_tiling(b):
    """Pad batch to a bf16-friendly sublane multiple; pick the batch tile."""
    bp = _round_up(max(b, 16), 16)
    if bp >= 128:
        tm = 128
        bp = _round_up(bp, 128)
    else:
        tm = bp
    return bp, tm


def _pick_tk(kp):
    """Largest K tile in {512, 256, 128} dividing the (128-padded) K dim."""
    for cand in (512, 256, 128):
        if kp % cand == 0:
            return cand
    return 128


_VMEM_LIMIT = 32 * 1024 * 1024      # well under v7x's 64 MiB physical VMEM
_SINGLE_SHOT_BYTES = 8 * 1024 * 1024  # per-step VMEM budget for the 1-pass kernel


# -----------------------------------------------------------------------------
# Pallas kernels
# -----------------------------------------------------------------------------
def _softmax_rows(logits):
    """Numerically-stable row softmax in f32; denominator via EUP reciprocal."""
    m = jnp.max(logits, axis=-1, keepdims=True)
    e = jnp.exp(logits - m)                     # padded cols (-1e30 bias) -> 0
    denom = jnp.sum(e, axis=-1, keepdims=True)
    return e * pl.reciprocal(denom, approx=True)


def _fused_single_kernel(x_ref, w1_ref, b1_ref, w2_ref, b2_ref, o_ref):
    """softmax(relu(x@W1+b1) @ W2 + b2); grid = (batch tiles,). No scratch."""
    h = jnp.dot(x_ref[...], w1_ref[...],
                preferred_element_type=jnp.float32) + b1_ref[...]
    h = jnp.maximum(h, 0.0).astype(w2_ref.dtype)            # bf16 for MXU
    logits = jnp.dot(h, w2_ref[...],
                     preferred_element_type=jnp.float32) + b2_ref[...]
    o_ref[...] = _softmax_rows(logits).astype(o_ref.dtype)


def _fused_ktiled_kernel(x_ref, w1_ref, b1_ref, w2_ref, b2_ref, o_ref, acc_ref):
    """Same math, K-reduction tiled; grid = (batch tiles, K tiles)."""
    k = pl.program_id(1)
    nk = pl.num_programs(1)

    @pl.when(k == 0)
    def _():
        # Fold the first bias into the accumulator init (applied exactly once).
        acc_ref[...] = jnp.broadcast_to(b1_ref[...], acc_ref.shape)

    acc_ref[...] += jnp.dot(x_ref[...], w1_ref[...],
                            preferred_element_type=jnp.float32)

    @pl.when(k == nk - 1)
    def _():
        h = jnp.maximum(acc_ref[...], 0.0).astype(w2_ref.dtype)
        logits = jnp.dot(h, w2_ref[...],
                         preferred_element_type=jnp.float32) + b2_ref[...]
        o_ref[...] = _softmax_rows(logits).astype(o_ref.dtype)


def _subnet_kernel(x_ref, w1_ref, b1_ref, o_ref, acc_ref):
    """features = relu(x @ W1 + b1); grid = (batch tiles, K tiles)."""
    k = pl.program_id(1)

    @pl.when(k == 0)
    def _():
        acc_ref[...] = jnp.broadcast_to(b1_ref[...], acc_ref.shape)

    acc_ref[...] += jnp.dot(x_ref[...], w1_ref[...],
                            preferred_element_type=jnp.float32)

    @pl.when(k == pl.num_programs(1) - 1)
    def _():
        o_ref[...] = jnp.maximum(acc_ref[...], 0.0).astype(o_ref.dtype)


def _wrapper_kernel(h_ref, w2_ref, b2_ref, o_ref):
    """output = softmax(h @ W2 + b2); grid = (batch tiles,)."""
    logits = jnp.dot(h_ref[...], w2_ref[...],
                     preferred_element_type=jnp.float32) + b2_ref[...]
    o_ref[...] = _softmax_rows(logits).astype(o_ref.dtype)


# -----------------------------------------------------------------------------
# Jitted host-side wrappers (single dispatch each; padding done on device)
# -----------------------------------------------------------------------------
def _pad_rows(x, bp, kp):
    b, k = x.shape
    return jnp.zeros((bp, kp), jnp.bfloat16).at[:b, :k].set(x.astype(jnp.bfloat16))


@functools.partial(jax.jit, static_argnames=("out_dim",))
def _fused_forward(x_flat, w1, b1, w2, b2, *, out_dim):
    B, K = x_flat.shape
    Kp, Hp = w1.shape
    Op = w2.shape[1]
    Bp, TM = _batch_tiling(B)
    xp = _pad_rows(x_flat, Bp, Kp)

    # Per-step VMEM footprint of the single-shot kernel (bf16 operands).
    single_bytes = 2 * (TM * Kp + Kp * Hp + Hp * Op) + 4 * (Hp + Op + TM * Op)

    if single_bytes <= _SINGLE_SHOT_BYTES:
        out = pl.pallas_call(
            _fused_single_kernel,
            out_shape=jax.ShapeDtypeStruct((Bp, Op), jnp.float32),
            grid_spec=pltpu.PrefetchScalarGridSpec(
                num_scalar_prefetch=0,
                grid=(Bp // TM,),
                in_specs=[
                    pl.BlockSpec((TM, Kp), lambda i: (i, 0)),   # x tile
                    pl.BlockSpec((Kp, Hp), lambda i: (0, 0)),   # W1 (resident)
                    pl.BlockSpec((1, Hp), lambda i: (0, 0)),    # b1 (resident)
                    pl.BlockSpec((Hp, Op), lambda i: (0, 0)),   # W2 (resident)
                    pl.BlockSpec((1, Op), lambda i: (0, 0)),    # b2 (resident)
                ],
                out_specs=pl.BlockSpec((TM, Op), lambda i: (i, 0)),
            ),
            compiler_params=pltpu.CompilerParams(
                dimension_semantics=("parallel",),
                vmem_limit_bytes=_VMEM_LIMIT,
            ),
        )(xp, w1, b1, w2, b2)
    else:
        TK = _pick_tk(Kp)
        out = pl.pallas_call(
            _fused_ktiled_kernel,
            out_shape=jax.ShapeDtypeStruct((Bp, Op), jnp.float32),
            grid_spec=pltpu.PrefetchScalarGridSpec(
                num_scalar_prefetch=0,
                grid=(Bp // TM, Kp // TK),
                in_specs=[
                    pl.BlockSpec((TM, TK), lambda i, k: (i, k)),   # x tile
                    pl.BlockSpec((TK, Hp), lambda i, k: (k, 0)),   # W1 (streamed)
                    pl.BlockSpec((1, Hp), lambda i, k: (0, 0)),    # b1 (resident)
                    pl.BlockSpec((Hp, Op), lambda i, k: (0, 0)),   # W2 (resident)
                    pl.BlockSpec((1, Op), lambda i, k: (0, 0)),    # b2 (resident)
                ],
                out_specs=pl.BlockSpec((TM, Op), lambda i, k: (i, 0)),
                scratch_shapes=[pltpu.VMEM((TM, Hp), jnp.float32)],
            ),
            compiler_params=pltpu.CompilerParams(
                dimension_semantics=("parallel", "arbitrary"),
                vmem_limit_bytes=_VMEM_LIMIT,
            ),
        )(xp, w1, b1, w2, b2)
    return out[:B, :out_dim]


@functools.partial(jax.jit, static_argnames=("hidden_dim",))
def _subnetwork_forward(x_flat, w1, b1, *, hidden_dim):
    B, K = x_flat.shape
    Kp, Hp = w1.shape
    Bp, TM = _batch_tiling(B)
    TK = _pick_tk(Kp)
    xp = _pad_rows(x_flat, Bp, Kp)

    out = pl.pallas_call(
        _subnet_kernel,
        out_shape=jax.ShapeDtypeStruct((Bp, Hp), jnp.float32),
        grid_spec=pltpu.PrefetchScalarGridSpec(
            num_scalar_prefetch=0,
            grid=(Bp // TM, Kp // TK),
            in_specs=[
                pl.BlockSpec((TM, TK), lambda i, k: (i, k)),
                pl.BlockSpec((TK, Hp), lambda i, k: (k, 0)),
                pl.BlockSpec((1, Hp), lambda i, k: (0, 0)),
            ],
            out_specs=pl.BlockSpec((TM, Hp), lambda i, k: (i, 0)),
            scratch_shapes=[pltpu.VMEM((TM, Hp), jnp.float32)],
        ),
        compiler_params=pltpu.CompilerParams(
            dimension_semantics=("parallel", "arbitrary"),
            vmem_limit_bytes=_VMEM_LIMIT,
        ),
    )(xp, w1, b1)
    return out[:B, :hidden_dim]


@functools.partial(jax.jit, static_argnames=("out_dim",))
def _wrapper_forward(h, w2, b2, *, out_dim):
    B, H = h.shape
    Hp, Op = w2.shape
    Bp, TM = _batch_tiling(B)
    hp = _pad_rows(h, Bp, Hp)

    out = pl.pallas_call(
        _wrapper_kernel,
        out_shape=jax.ShapeDtypeStruct((Bp, Op), jnp.float32),
        grid_spec=pltpu.PrefetchScalarGridSpec(
            num_scalar_prefetch=0,
            grid=(Bp // TM,),
            in_specs=[
                pl.BlockSpec((TM, Hp), lambda i: (i, 0)),
                pl.BlockSpec((Hp, Op), lambda i: (0, 0)),
                pl.BlockSpec((1, Op), lambda i: (0, 0)),
            ],
            out_specs=pl.BlockSpec((TM, Op), lambda i: (i, 0)),
        ),
        compiler_params=pltpu.CompilerParams(
            dimension_semantics=("parallel",),
            vmem_limit_bytes=_VMEM_LIMIT,
        ),
    )(hp, w2, b2)
    return out[:B, :out_dim]


# -----------------------------------------------------------------------------
# JAX/Pallas port of AbstractModelWrapper
# -----------------------------------------------------------------------------
class PallasAbstractModelWrapper:
    """Mirrors AbstractModelWrapper.forward semantics with Pallas kernels."""

    def __init__(self, in_features, hidden_dim, out_dim, key):
        k1, k2, k3, k4 = jax.random.split(key, 4)
        self.in_features = in_features
        self.hidden_dim = hidden_dim
        self.out_dim = out_dim

        Kp = _round_up(in_features, 128)
        Hp = _round_up(hidden_dim, 128)
        Op = _round_up(out_dim, 128)

        # Logical (unpadded) parameters, f32.
        w1 = (jax.random.normal(k1, (in_features, hidden_dim), jnp.float32)
              * (1.0 / jnp.sqrt(in_features)))
        b1 = jax.random.normal(k2, (1, hidden_dim), jnp.float32) * 0.01
        w2 = (jax.random.normal(k3, (hidden_dim, out_dim), jnp.float32)
              * (1.0 / jnp.sqrt(hidden_dim)))
        b2 = jax.random.normal(k4, (1, out_dim), jnp.float32) * 0.01

        # Padded, lane-dense device copies.  Weights in bf16 (half HBM traffic,
        # full MXU rate on v6e/v7x); biases / accumulation stay f32.
        self.w1 = jnp.zeros((Kp, Hp), jnp.bfloat16).at[
            :in_features, :hidden_dim].set(w1.astype(jnp.bfloat16))
        self.b1 = jnp.zeros((1, Hp), jnp.float32).at[:, :hidden_dim].set(b1)
        self.w2 = jnp.zeros((Hp, Op), jnp.bfloat16).at[
            :hidden_dim, :out_dim].set(w2.astype(jnp.bfloat16))
        # Padded output columns get a huge negative bias so exp() kills them
        # and they do not contribute to the softmax denominator.
        self.b2 = jnp.full((1, Op), -1e30, jnp.float32).at[:, :out_dim].set(b2)

        self.eval_direct = False
        self.cache = {}

    def set_eval_direct(self, eval_direct):
        self.eval_direct = eval_direct

    # ---- abstract hooks, instantiated ----
    def subnetwork_eval(self, x):
        # x: (B, C, H, W) NCHW  ->  (B, C*H*W) flatten -> relu(x @ W1 + b1).
        B = x.shape[0]
        x_flat = jnp.reshape(x, (B, -1))
        return _subnetwork_forward(x_flat, self.w1, self.b1,
                                   hidden_dim=self.hidden_dim)

    def wrapper_eval(self, h):
        # h: (B, hidden_dim)  ->  (B, out_dim) softmax probabilities.
        return _wrapper_forward(h, self.w2, self.b2, out_dim=self.out_dim)

    # ---- cached subnetwork evaluation (Python-side cache, like torch) ----
    def subnetwork_cached_eval(self, x, indices, group):
        cache = self.cache.get(group, {})
        if all(ind in cache for ind in indices):
            output = jnp.concatenate([cache[ind] for ind in indices], axis=0)
        else:
            output = self.subnetwork_eval(x)
            for i, ind in enumerate(indices):
                cache[ind] = output[i][None, :]
        self.cache[group] = cache
        return output

    def forward(self, x, indices=None, group=None):
        if not self.eval_direct:
            if indices is None:
                # Hot path: fused subnetwork+wrapper kernel; the feature tensor
                # never leaves VMEM.  (detach() does not change forward values,
                # so fusion is forward-exact.)
                B = x.shape[0]
                x_flat = jnp.reshape(x, (B, -1))
                return _fused_forward(x_flat, self.w1, self.b1,
                                      self.w2, self.b2, out_dim=self.out_dim)
            inp = self.subnetwork_cached_eval(x, indices=indices, group=group)
            inp = jax.lax.stop_gradient(inp)  # detach(): base model is frozen
        else:
            inp = x
        return self.wrapper_eval(inp)

    __call__ = forward


# -----------------------------------------------------------------------------
# Demo / smoke test
# -----------------------------------------------------------------------------
if __name__ == "__main__":
    key = jax.random.PRNGKey(0)
    kx, kp = jax.random.split(key)

    B, C, H, W = 2, 4, 16, 16          # NCHW input
    hidden_dim, out_dim = 32, 8
    in_features = C * H * W            # 1024

    x = jax.random.normal(kx, (B, C, H, W), jnp.float32)

    model = PallasAbstractModelWrapper(in_features, hidden_dim, out_dim, kp)

    # 1) Normal (fused) path: relu(x@W1+b1) @ W2 + b2 -> softmax, one kernel.
    out = jax.block_until_ready(model.forward(x))
    assert out.shape == (B, out_dim)
    # Softmax rows sum to ~1 (approx reciprocal => relaxed tolerance).
    assert jnp.allclose(jnp.sum(out, axis=-1), 1.0, atol=1e-2)

    # Cross-check fusion against the unfused subnetwork->wrapper kernels.
    ref = model.wrapper_eval(model.subnetwork_eval(x))
    assert jnp.allclose(out, ref, atol=2e-2)

    # 2) Cached path: first call populates the cache, second call reads it.
    out_c1 = jax.block_until_ready(model.forward(x, indices=[0, 1], group="g"))
    out_c2 = jax.block_until_ready(model.forward(x, indices=[0, 1], group="g"))
    assert jnp.allclose(out_c1, out_c2, atol=1e-6)

    # 3) eval_direct path: wrapper_eval applied directly to features.
    feats = model.subnetwork_eval(x)
    model.set_eval_direct(True)
    out_d = jax.block_until_ready(model.forward(feats))
    assert out_d.shape == (B, out_dim)

    print("KERNEL_OK")
</pallas_src>

<mosaic_0001>
module attributes {stable_mosaic.version = 11 : i64} {
  func.func @_fused_single_kernel(%arg0: i32, %arg1: memref<16x1024xbf16, #tpu.memory_space<vmem>>, %arg2: memref<1024x128xbf16, #tpu.memory_space<vmem>>, %arg3: memref<1x128xf32, #tpu.memory_space<vmem>>, %arg4: memref<128x128xbf16, #tpu.memory_space<vmem>>, %arg5: memref<1x128xf32, #tpu.memory_space<vmem>>, %arg6: memref<16x128xf32, #tpu.memory_space<vmem>>) attributes {dimension_semantics = [#tpu.dimension_semantics<parallel>], iteration_bounds = array<i64: 1>, scalar_prefetch = 0 : i64, scratch_operands = 0 : i64, tpu.core_type = #tpu.core_type<tc>, window_params = [{transform_indices = @transform_0, window_bounds = array<i64: 16, 1024>}, {pipeline_mode = #tpu.pipeline_mode<synchronous>, transform_indices = @transform_1, window_bounds = array<i64: 1024, 128>}, {pipeline_mode = #tpu.pipeline_mode<synchronous>, transform_indices = @transform_2, window_bounds = array<i64: 1, 128>}, {pipeline_mode = #tpu.pipeline_mode<synchronous>, transform_indices = @transform_3, window_bounds = array<i64: 128, 128>}, {pipeline_mode = #tpu.pipeline_mode<synchronous>, transform_indices = @transform_4, window_bounds = array<i64: 1, 128>}, {transform_indices = @transform_5, window_bounds = array<i64: 16, 128>}]} {
    %c0 = arith.constant 0 : index
    %c0_0 = arith.constant 0 : index
    %0 = vector.load %arg1[%c0, %c0_0] : memref<16x1024xbf16, #tpu.memory_space<vmem>>, vector<16x1024xbf16>
    %c0_1 = arith.constant 0 : index
    %c0_2 = arith.constant 0 : index
    %1 = vector.load %arg2[%c0_1, %c0_2] : memref<1024x128xbf16, #tpu.memory_space<vmem>>, vector<1024x128xbf16>
    %cst = arith.constant dense<0.000000e+00> : vector<16x128xf32>
    %2 = tpu.matmul %0, %1, %cst {dimension_numbers = #tpu.dot_dimension_numbers<[1], [0], [0], [1], [0, 0, 1, 1], [], []>} : vector<16x1024xbf16>, vector<1024x128xbf16>, vector<16x128xf32> -> vector<16x128xf32>
    %c0_3 = arith.constant 0 : index
    %c0_4 = arith.constant 0 : index
    %3 = vector.load %arg3[%c0_3, %c0_4] : memref<1x128xf32, #tpu.memory_space<vmem>>, vector<1x128xf32>
    %4 = vector.broadcast %3 : vector<1x128xf32> to vector<16x128xf32>
    %5 = arith.addf %2, %4 : vector<16x128xf32>
    %cst_5 = arith.constant 0.000000e+00 : f32
    %6 = vector.broadcast %cst_5 : f32 to vector<16x128xf32>
    %7 = arith.maximumf %5, %6 : vector<16x128xf32>
    %8 = arith.truncf %7 : vector<16x128xf32> to vector<16x128xbf16>
    %c0_6 = arith.constant 0 : index
    %c0_7 = arith.constant 0 : index
    %9 = vector.load %arg4[%c0_6, %c0_7] : memref<128x128xbf16, #tpu.memory_space<vmem>>, vector<128x128xbf16>
    %cst_8 = arith.constant dense<0.000000e+00> : vector<16x128xf32>
    %10 = tpu.matmul %8, %9, %cst_8 {dimension_numbers = #tpu.dot_dimension_numbers<[1], [0], [0], [1], [0, 0, 1, 1], [], []>} : vector<16x128xbf16>, vector<128x128xbf16>, vector<16x128xf32> -> vector<16x128xf32>
    %c0_9 = arith.constant 0 : index
    %c0_10 = arith.constant 0 : index
    %11 = vector.load %arg5[%c0_9, %c0_10] : memref<1x128xf32, #tpu.memory_space<vmem>>, vector<1x128xf32>
    %12 = vector.broadcast %11 : vector<1x128xf32> to vector<16x128xf32>
    %13 = arith.addf %10, %12 : vector<16x128xf32>
    %cst_11 = arith.constant dense<0xFF800000> : vector<16xf32>
    %14 = vector.multi_reduction <maximumf>, %13, %cst_11 [1] : vector<16x128xf32> to vector<16xf32>
    %15 = vector.shape_cast %14 : vector<16xf32> to vector<16x1xf32>
    %16 = vector.broadcast %15 : vector<16x1xf32> to vector<16x128xf32>
    %17 = arith.subf %13, %16 : vector<16x128xf32>
    %18 = math.exp %17 : vector<16x128xf32>
    %cst_12 = arith.constant dense<0.000000e+00> : vector<16xf32>
    %19 = vector.multi_reduction <add>, %18, %cst_12 [1] : vector<16x128xf32> to vector<16xf32>
    %20 = vector.shape_cast %19 : vector<16xf32> to vector<16x1xf32>
    %21 = tpu.reciprocal %20 {approx = true} : vector<16x1xf32> -> vector<16x1xf32>
    %22 = vector.broadcast %21 : vector<16x1xf32> to vector<16x128xf32>
    %23 = arith.mulf %18, %22 : vector<16x128xf32>
    %c0_13 = arith.constant 0 : index
    %c0_14 = arith.constant 0 : index
    %24 = vector.load %arg6[%c0_13, %c0_14] : memref<16x128xf32, #tpu.memory_space<vmem>>, vector<16x128xf32>
    tpu.vector_store %arg6[%c0_13, %c0_14], %23 {strides = array<i32>} : memref<16x128xf32, #tpu.memory_space<vmem>>, vector<16x128xf32>,
    return
  }
  func.func @transform_0(%arg0: i32) -> (i32, i32) {
    %c0_i32 = arith.constant 0 : i32
    %c0_i32_0 = arith.constant 0 : i32
    return %arg0, %c0_i32 : i32, i32
  }
  func.func @transform_1(%arg0: i32) -> (i32, i32) {
    %c0_i32 = arith.constant 0 : i32
    %c0_i32_0 = arith.constant 0 : i32
    %c0_i32_1 = arith.constant 0 : i32
    return %c0_i32, %c0_i32_0 : i32, i32
  }
  func.func @transform_2(%arg0: i32) -> (i32, i32) {
    %c0_i32 = arith.constant 0 : i32
    %c0_i32_0 = arith.constant 0 : i32
    %c0_i32_1 = arith.constant 0 : i32
    return %c0_i32, %c0_i32_0 : i32, i32
  }
  func.func @transform_3(%arg0: i32) -> (i32, i32) {
    %c0_i32 = arith.constant 0 : i32
    %c0_i32_0 = arith.constant 0 : i32
    %c0_i32_1 = arith.constant 0 : i32
    return %c0_i32, %c0_i32_0 : i32, i32
  }
  func.func @transform_4(%arg0: i32) -> (i32, i32) {
    %c0_i32 = arith.constant 0 : i32
    %c0_i32_0 = arith.constant 0 : i32
    %c0_i32_1 = arith.constant 0 : i32
    return %c0_i32, %c0_i32_0 : i32, i32
  }
  func.func @transform_5(%arg0: i32) -> (i32, i32) {
    %c0_i32 = arith.constant 0 : i32
    %c0_i32_0 = arith.constant 0 : i32
    return %arg0, %c0_i32 : i32, i32
  }
}

</mosaic_0001>

<bundles_post_ra>
// kernel: _fused_forward.1
= control target key start
LH: loop header
LB: loop body
LE: loop exit
PB: predicated region body
PF: predicated region fallthrough
CT: control target
= control target key end

     0   :  { %10 = vsyncpa [#allocation3], 0  ;;  %s1214_s18 = smov [#allocation2]   ;;  %s1321_s0 = inlined_call_operand.vmem [shape: bf16[16,1024], index: 0, kind: input, shape index: {}]   ;;  %s1322_s1 = inlined_call_operand.hbm [shape: bf16[1024,128], index: 1, kind: input, shape index: {}]   ;;  %s1323_s2 = inlined_call_operand.vmem [shape: f32[1,128], index: 2, kind: input, shape index: {}]   ;;  %s1324_s3 = inlined_call_operand.vmem [shape: bf16[128,128], index: 3, kind: input, shape index: {}]   ;;  %s1325_s4 = inlined_call_operand.vmem [shape: f32[1,128], index: 4, kind: input, shape index: {}]   ;;  %s1326_s5 = inlined_call_operand.vmem [shape: f32[16,128], index: 5, kind: output, shape index: {}]  }
   0x1   :  { %s18_s19 = sshll.u32 %s1214_s18, 4  ;;  %s1190_s22 = scalar_lea.hbm %s1322_s1, 8192  ;;  %s19_s19 = int_to_ptr.vmem [resolvable:$true] %s18_s19 }
   0x2   :  { %p1191_p0 = scmp.ne.s32.totalorder %s1322_s1, %s1190_s22  ;;  %p1194_p1 = scmp.lt.u32.totalorder %s1190_s22, %s1322_s1 }
   0x4   :  { %p1196_p2 = pnand %p1194_p1, %p1191_p0 }
   0x6   :  { %1199 = shalt.err (!%p1196_p2)
}
   0x7   :  { %s1200_s27 = scalar_lea.vmem %s19_s19, 8192  ;;  %p1205_p4 = scmp.lt.s32.totalorder %s19_s19, %s19_s19 }
   0x8   :  { %p1201_p3 = scmp.ne.s32.totalorder %s19_s19, %s1200_s27  ;;  %p1206_p5 = scmp.lt.s32.totalorder %s1200_s27, %s1200_s27 }
   0xa   :  { %p1207_p6 = por %p1206_p5, %p1205_p4 }
   0xc   :  { %p1208_p7 = pnand %p1207_p6, %p1201_p3 }
   0xe   :  { %1211 = shalt.err (!%p1208_p7)
}
   0xf   :  { %s1215_s28 = smov 64   ;;  %s1216_s29 = smov 4  }
  0x10   :  { %24 = dma.hbm_to_vmem [thread:$0]  %s1322_s1, 8192, %s19_s19, [#allocation3], %s1215_s28, %s1215_s28, %s1216_s29  }
  0x11   :  { %1212 = dma.done.wait [#allocation3], 8192  }
  0x12   :  { %1213 = vsyncadd [#allocation3], 4294959104  ;;  %v1110_v0 = vld [vmem:[#allocation2 + $0x40] sm:$0xff]   ;;  %v1114_v4 = vld [vmem:[#allocation2 + $0x48] sm:$0xff]   ;;  %vm1218_vm0 = vmmov 0  }
  0x13   :  { %v1111_v1 = vld [vmem:[#allocation2 + $0xc0] sm:$0xff]   ;;  %988 = vmatprep.subr.bf16.mxu0 %v1110_v0  ;;  %v1115_v5 = vld [vmem:[#allocation2 + $0xc8] sm:$0xff]   ;;  %v1118_v8 = vld [vmem:[#allocation2 + $0x50] sm:$0xff]  }
  0x14   :  { %v1112_v2 = vld [vmem:[#allocation2] sm:$0xff]   ;;  %1010 = vmatprep.subr.bf16.mxu1 %v1111_v1  ;;  %v1116_v6 = vld [vmem:[#allocation2 + $0x8] sm:$0xff]   ;;  %v1119_v9 = vld [vmem:[#allocation2 + $0xd0] sm:$0xff]  }
  0x15   :  { %v1113_v3 = vld [vmem:[#allocation2 + $0x80] sm:$0xff]   ;;  %989 = vmatpush3.bf16.msra.mxu0 %v1112_v2  ;;  %v1117_v7 = vld [vmem:[#allocation2 + $0x88] sm:$0xff]   ;;  %v1120_v10 = vld [vmem:[#allocation2 + $0x10] sm:$0xff]  }
  0x16   :  { %1011 = vmatpush3.bf16.msra.mxu1 %v1113_v3  ;;  %990 = vmatprep.subr.bf16.mxu0 %v1114_v4  ;;  %v1121_v11 = vld [vmem:[#allocation2 + $0x90] sm:$0xff]   ;;  %v1122_v12 = vld [vmem:[#allocation2 + $0x58] sm:$0xff]   ;;  %v1126_v16 = vld [vmem:[#allocation2 + $0x60] sm:$0xff]  }
  0x17   :  { %1012 = vmatprep.subr.bf16.mxu1 %v1115_v5  ;;  %v1123_v13 = vld [vmem:[#allocation2 + $0xd8] sm:$0xff]   ;;  %v1127_v17 = vld [vmem:[#allocation2 + $0xe0] sm:$0xff]   ;;  %v1130_v20 = vld [vmem:[#allocation2 + $0x68] sm:$0xff]  }
  0x18   :  { %v1124_v14 = vld [vmem:[#allocation2 + $0x18] sm:$0xff]   ;;  %v1128_v18 = vld [vmem:[#allocation2 + $0x20] sm:$0xff]   ;;  %v1131_v21 = vld [vmem:[#allocation2 + $0xe8] sm:$0xff]  }
  0x19   :  { %991 = vmatpush3.bf16.msra.mxu0 %v1116_v6  ;;  %v1125_v15 = vld [vmem:[#allocation2 + $0x98] sm:$0xff]   ;;  %v1129_v19 = vld [vmem:[#allocation2 + $0xa0] sm:$0xff]   ;;  %v1132_v22 = vld [vmem:[#allocation2 + $0x28] sm:$0xff]  }
  0x1a   :  { %1013 = vmatpush3.bf16.msra.mxu1 %v1117_v7  ;;  %992 = vmatprep.subr.bf16.mxu0 %v1118_v8  ;;  %v1133_v23 = vld [vmem:[#allocation2 + $0xa8] sm:$0xff]   ;;  %v1134_v24 = vld [vmem:[#allocation2 + $0x70] sm:$0xff]   ;;  %v1138_v28 = vld [vmem:[#allocation2 + $0x78] sm:$0xff]  }
  0x1b   :  { %1014 = vmatprep.subr.bf16.mxu1 %v1119_v9  ;;  %v1135_v25 = vld [vmem:[#allocation2 + $0xf0] sm:$0xff]   ;;  %v1139_v29 = vld [vmem:[#allocation2 + $0xf8] sm:$0xff]   ;;  %v35_v32 = vld [vmem:[%s1321_s0] sm:$0xff] }
  0x1c   :  { %v1136_v26 = vld [vmem:[#allocation2 + $0x30] sm:$0xff]   ;;  %v1140_v30 = vld [vmem:[#allocation2 + $0x38] sm:$0xff]   ;;  %v39_v33 = vld [vmem:[%s1321_s0 + $0x20] sm:$0xff] }
  0x1d   :  { %993 = vmatpush3.bf16.msra.mxu0 %v1120_v10  ;;  %v1137_v27 = vld [vmem:[#allocation2 + $0xb0] sm:$0xff]   ;;  %v1141_v31 = vld [vmem:[#allocation2 + $0xb8] sm:$0xff]   ;;  %v36_v34 = vld [vmem:[%s1321_s0 + $0x8] sm:$0xff]  ;;  %v907_v35 = vcombine.low %v35_v32, %v39_v33  ;;  %v908_v36 = vcombine.high %v35_v32, %v39_v33 }
  0x1e   :  { %1015 = vmatpush3.bf16.msra.mxu1 %v1121_v11  ;;  %994 = vmatprep.subr.bf16.mxu0 %v1122_v12  ;;  %v40_v37 = vld [vmem:[%s1321_s0 + $0x28] sm:$0xff]  ;;  %v1142_v40 = vld [vmem:[#allocation2 + $0x140] sm:$0xff]   ;;  %v1150_v48 = vld [vmem:[#allocation2 + $0x150] sm:$0xff]  }
  0x1f   :  { %1016 = vmatprep.subr.bf16.mxu1 %v1123_v13  ;;  %v909_v38 = vcombine.low %v36_v34, %v40_v37  ;;  %v910_v39 = vcombine.high %v36_v34, %v40_v37  ;;  %634 = vmatprep.mubr.bf16.mxu0 %v908_v36  ;;  %v1143_v41 = vld [vmem:[#allocation2 + $0x1c0] sm:$0xff]   ;;  %v1146_v44 = vld [vmem:[#allocation2 + $0x148] sm:$0xff]   ;;  %v1151_v49 = vld [vmem:[#allocation2 + $0x1d0] sm:$0xff]  }
  0x20   :  { %v1144_v42 = vld [vmem:[#allocation2 + $0x100] sm:$0xff]   ;;  %v1147_v45 = vld [vmem:[#allocation2 + $0x1c8] sm:$0xff]   ;;  %v1152_v50 = vld [vmem:[#allocation2 + $0x110] sm:$0xff]  }
  0x21   :  { %995 = vmatpush3.bf16.msra.mxu0 %v1124_v14  ;;  %675 = vmatprep.mubr.bf16.mxu1 %v910_v39  ;;  %v1145_v43 = vld [vmem:[#allocation2 + $0x180] sm:$0xff]   ;;  %v1148_v46 = vld [vmem:[#allocation2 + $0x108] sm:$0xff]   ;;  %v1153_v51 = vld [vmem:[#allocation2 + $0x190] sm:$0xff]  }
  0x22   :  { %1017 = vmatpush3.bf16.msra.mxu1 %v1125_v15  ;;  %996 = vmatprep.subr.bf16.mxu0 %v1126_v16  ;;  %v1149_v47 = vld [vmem:[#allocation2 + $0x188] sm:$0xff]   ;;  %v1154_v52 = vld [vmem:[#allocation2 + $0x158] sm:$0xff]   ;;  %v1158_v56 = vld [vmem:[#allocation2 + $0x160] sm:$0xff]  }
  0x23   :  { %1018 = vmatprep.subr.bf16.mxu1 %v1127_v17  ;;  %v1155_v53 = vld [vmem:[#allocation2 + $0x1d8] sm:$0xff]   ;;  %v1159_v57 = vld [vmem:[#allocation2 + $0x1e0] sm:$0xff]   ;;  %v1162_v60 = vld [vmem:[#allocation2 + $0x168] sm:$0xff]   ;;  %v1217_v17 = vmov 0.0  }
  0x24   :  { %v1156_v54 = vld [vmem:[#allocation2 + $0x118] sm:$0xff]   ;;  %v1160_v58 = vld [vmem:[#allocation2 + $0x120] sm:$0xff]   ;;  %v1163_v61 = vld [vmem:[#allocation2 + $0x1e8] sm:$0xff]  }
  0x25   :  { %997 = vmatpush3.bf16.msra.mxu0 %v1128_v18  ;;  %v1157_v55 = vld [vmem:[#allocation2 + $0x198] sm:$0xff]   ;;  %v1161_v59 = vld [vmem:[#allocation2 + $0x1a0] sm:$0xff]   ;;  %v1164_v62 = vld [vmem:[#allocation2 + $0x128] sm:$0xff]  }
  0x26   :  { %1019 = vmatpush3.bf16.msra.mxu1 %v1129_v19  ;;  %998 = vmatprep.subr.bf16.mxu0 %v1130_v20  ;;  %v1165_v63 = vld [vmem:[#allocation2 + $0x1a8] sm:$0xff]   ;;  %v1166_v0 = vld [vmem:[#allocation2 + $0x170] sm:$0xff]   ;;  %v1170_v4 = vld [vmem:[#allocation2 + $0x178] sm:$0xff]  }
  0x27   :  { %1020 = vmatprep.subr.bf16.mxu1 %v1131_v21  ;;  %v1167_v1 = vld [vmem:[#allocation2 + $0x1f0] sm:$0xff]   ;;  %v1171_v5 = vld [vmem:[#allocation2 + $0x1f8] sm:$0xff]   ;;  %v1174_v16 = vld [vmem:[%s1324_s3] sm:$0xff]  }
  0x28   :  { %v1168_v2 = vld [vmem:[#allocation2 + $0x130] sm:$0xff]   ;;  %v1172_v6 = vld [vmem:[#allocation2 + $0x138] sm:$0xff]   ;;  %v1175_v18 = vld [vmem:[%s1324_s3 + $0x8] sm:$0xff]  }
  0x29   :  { %999 = vmatpush3.bf16.msra.mxu0 %v1132_v22  ;;  %v1169_v3 = vld [vmem:[#allocation2 + $0x1b0] sm:$0xff]   ;;  %v1173_v7 = vld [vmem:[#allocation2 + $0x1b8] sm:$0xff]   ;;  %v1178_v21 = vld [vmem:[%s1324_s3 + $0x20] sm:$0xff]  }
  0x2a   :  { %1021 = vmatpush3.bf16.msra.mxu1 %v1133_v23  ;;  %1000 = vmatprep.subr.bf16.mxu0 %v1134_v24  ;;  %v37_v8 = vld [vmem:[%s1321_s0 + $0x10] sm:$0xff]  ;;  %v38_v12 = vld [vmem:[%s1321_s0 + $0x18] sm:$0xff]  ;;  %v1179_v22 = vld [vmem:[%s1324_s3 + $0x28] sm:$0xff]  }
  0x2b   :  { %1022 = vmatprep.subr.bf16.mxu1 %v1135_v25  ;;  %v41_v9 = vld [vmem:[%s1321_s0 + $0x30] sm:$0xff]  ;;  %v42_v13 = vld [vmem:[%s1321_s0 + $0x38] sm:$0xff] }
  0x2c   :  { %v911_v10 = vcombine.low %v37_v8, %v41_v9  ;;  %v912_v11 = vcombine.high %v37_v8, %v41_v9  ;;  %v913_v14 = vcombine.low %v38_v12, %v42_v13  ;;  %v914_v15 = vcombine.high %v38_v12, %v42_v13  ;;  %v1176_v19 = vld [vmem:[%s1324_s3 + $0x10] sm:$0xff]   ;;  %v1177_v20 = vld [vmem:[%s1324_s3 + $0x18] sm:$0xff]  }
  0x2d   :  { %1001 = vmatpush3.bf16.msra.mxu0 %v1136_v26  ;;  %v1180_v23 = vld [vmem:[%s1324_s3 + $0x30] sm:$0xff]   ;;  %v1181_v24 = vld [vmem:[%s1324_s3 + $0x38] sm:$0xff]  }
  0x2e   :  { %1023 = vmatpush3.bf16.msra.mxu1 %v1137_v27  ;;  %1002 = vmatprep.subr.bf16.mxu0 %v1138_v28  ;;  %v906_v27 = vld [vmem:[%s1323_s2] ss:$0 sm:$0xff] }
  0x2f   :  { %1024 = vmatprep.subr.bf16.mxu1 %v1139_v29 }
  0x31   :  { %1003 = vmatpush3.bf16.msra.mxu0 %v1140_v30 }
  0x32   :  { %1025 = vmatpush3.bf16.msra.mxu1 %v1141_v31  ;;  %1032 = vmatprep.subr.bf16.mxu0 %v1142_v40 }
  0x33   :  { %1054 = vmatprep.subr.bf16.mxu1 %v1143_v41 }
  0x34   :  { %635 = vmatmul.mubr.bf16.vlgmr.msra.gmra.mrb[0].mxu0 %v907_v35 }
  0x35   :  { %676 = vmatmul.mubr.bf16.vlgmr.msra.gmra.mrb[0].mxu1 %v909_v38  ;;  %1033 = vmatpush3.bf16.msra.mxu0 %v1144_v42 }
  0x36   :  { %1055 = vmatpush3.bf16.msra.mxu1 %v1145_v43  ;;  %1034 = vmatprep.subr.bf16.mxu0 %v1146_v44 }
  0x37   :  { %1056 = vmatprep.subr.bf16.mxu1 %v1147_v45  ;;  %716 = vmatprep.mubr.bf16.mxu0 %v912_v11 }
  0x38   :  { %757 = vmatprep.mubr.bf16.mxu1 %v914_v15 }
  0x39   :  { %1035 = vmatpush3.bf16.msra.mxu0 %v1148_v46 }
  0x3a   :  { %1057 = vmatpush3.bf16.msra.mxu1 %v1149_v47  ;;  %1036 = vmatprep.subr.bf16.mxu0 %v1150_v48 }
  0x3b   :  { %1058 = vmatprep.subr.bf16.mxu1 %v1151_v49 }
  0x3d   :  { %1037 = vmatpush3.bf16.msra.mxu0 %v1152_v50 }
  0x3e   :  { %1059 = vmatpush3.bf16.msra.mxu1 %v1153_v51  ;;  %1038 = vmatprep.subr.bf16.mxu0 %v1154_v52 }
  0x3f   :  { %1060 = vmatprep.subr.bf16.mxu1 %v1155_v53 }
  0x41   :  { %1039 = vmatpush3.bf16.msra.mxu0 %v1156_v54 }
  0x42   :  { %1061 = vmatpush3.bf16.msra.mxu1 %v1157_v55  ;;  %1040 = vmatprep.subr.bf16.mxu0 %v1158_v56 }
  0x43   :  { %1062 = vmatprep.subr.bf16.mxu1 %v1159_v57 }
  0x45   :  { %1041 = vmatpush3.bf16.msra.mxu0 %v1160_v58 }
  0x46   :  { %1063 = vmatpush3.bf16.msra.mxu1 %v1161_v59  ;;  %1042 = vmatprep.subr.bf16.mxu0 %v1162_v60 }
  0x47   :  { %1064 = vmatprep.subr.bf16.mxu1 %v1163_v61  ;;  %v979_v61 = vld [vmem:[%s1325_s4] ss:$0 sm:$0xff] }
  0x49   :  { %1043 = vmatpush3.bf16.msra.mxu0 %v1164_v62 }
  0x4a   :  { %1065 = vmatpush3.bf16.msra.mxu1 %v1165_v63  ;;  %1044 = vmatprep.subr.bf16.mxu0 %v1166_v0 }
  0x4b   :  { %1066 = vmatprep.subr.bf16.mxu1 %v1167_v1 }
  0x4d   :  { %1045 = vmatpush3.bf16.msra.mxu0 %v1168_v2 }
  0x4e   :  { %1067 = vmatpush3.bf16.msra.mxu1 %v1169_v3  ;;  %1046 = vmatprep.subr.bf16.mxu0 %v1170_v4 }
  0x4f   :  { %1068 = vmatprep.subr.bf16.mxu1 %v1171_v5 }
  0x51   :  { %1047 = vmatpush3.bf16.msra.mxu0 %v1172_v6 }
  0x52   :  { %1069 = vmatpush3.bf16.msra.mxu1 %v1173_v7  ;;  %1085 = vmatprep.subr.bf16.mxu0 %v1217_v17 }
  0x54   :  { %717 = vmatmul.mubr.bf16.vlgmr.msra.gmra.mrb[4].mxu0 %v911_v10 }
  0x55   :  { %758 = vmatmul.mubr.bf16.vlgmr.msra.gmra.mrb[4].mxu1 %v913_v14  ;;  %1086 = vmatpush3.bf16.msra.mxu0 %v1174_v16 }
  0x56   :  { %1087 = vmatprep.subr.bf16.mxu0 %v1217_v17  ;;  %1101 = vmatprep.mubr.msk.bf16.mxu0 %vm1218_vm0, %v1217_v17 }
  0x59   :  { %1088 = vmatpush3.bf16.msra.mxu0 %v1175_v18 }
  0x5a   :  { %1089 = vmatprep.subr.bf16.mxu0 %v1217_v17 }
  0x5d   :  { %1090 = vmatpush3.bf16.msra.mxu0 %v1176_v19 }
  0x5e   :  { %1091 = vmatprep.subr.bf16.mxu0 %v1217_v17 }
  0x61   :  { %1092 = vmatpush3.bf16.msra.mxu0 %v1177_v20 }
  0x62   :  { %1093 = vmatprep.subr.bf16.mxu0 %v1217_v17 }
  0x65   :  { %1094 = vmatpush3.bf16.msra.mxu0 %v1178_v21 }
  0x66   :  { %1095 = vmatprep.subr.bf16.mxu0 %v1217_v17 }
  0x69   :  { %1096 = vmatpush3.bf16.msra.mxu0 %v1179_v22 }
  0x6a   :  { %1097 = vmatprep.subr.bf16.mxu0 %v1217_v17 }
  0x6d   :  { %1098 = vmatpush3.bf16.msra.mxu0 %v1180_v23 }
  0x6e   :  { %1099 = vmatprep.subr.bf16.mxu0 %v1217_v17 }
  0x71   :  { %1100 = vmatpush3.bf16.msra.mxu0 %v1181_v24 }
 0x107   :  { %v1004_v25 = vpop.f32.mrb[0].mxu0 }
 0x108   :  { %v1026_v26 = vpop.f32.mrb[0].mxu1  ;;  %v1005_v28 = vpop.f32.mrb[1].mxu0 }
 0x109   :  { %v1006_v29 = vadd.f32 %v1005_v28, %v1004_v25  ;;  %v1027_v30 = vpop.f32.mrb[1].mxu1  ;;  %v1007_v31 = vpop.f32.mrb[2].mxu0 }
 0x10a   :  { %v1028_v32 = vadd.f32 %v1027_v30, %v1026_v26  ;;  %v1029_v33 = vpop.f32.mrb[2].mxu1  ;;  %v1008_v34 = vpop.f32.mrb[3].mxu0 }
 0x10b   :  { %v637_v35 = vadd.f32 %v1006_v29, %v906_v27  ;;  %v1009_v36 = vadd.f32 %v1008_v34, %v1007_v31  ;;  %v1030_v37 = vpop.f32.mrb[3].mxu1 }
 0x10c   :  { %v1031_v38 = vadd.f32 %v1030_v37, %v1029_v33 }
 0x10d   :  { %v678_v39 = vadd.f32 %v1028_v32, %v637_v35  ;;  %v640_v40 = vadd.f32 %v1009_v36, %v906_v27 }
 0x10f   :  { %v681_v41 = vadd.f32 %v1031_v38, %v640_v40 }
 0x127   :  { %v1048_v42 = vpop.f32.mrb[4].mxu0 }
 0x128   :  { %v1070_v43 = vpop.f32.mrb[4].mxu1  ;;  %v1049_v44 = vpop.f32.mrb[5].mxu0 }
 0x129   :  { %v1050_v45 = vadd.f32 %v1049_v44, %v1048_v42  ;;  %v1071_v46 = vpop.f32.mrb[5].mxu1  ;;  %v1051_v47 = vpop.f32.mrb[6].mxu0 }
 0x12a   :  { %v1072_v48 = vadd.f32 %v1071_v46, %v1070_v43  ;;  %v1073_v49 = vpop.f32.mrb[6].mxu1  ;;  %v1052_v50 = vpop.f32.mrb[7].mxu0 }
 0x12b   :  { %v719_v51 = vadd.f32 %v1050_v45, %v678_v39  ;;  %v1053_v52 = vadd.f32 %v1052_v50, %v1051_v47  ;;  %v1074_v53 = vpop.f32.mrb[7].mxu1 }
 0x12c   :  { %v1075_v54 = vadd.f32 %v1074_v53, %v1073_v49 }
 0x12d   :  { %v760_v55 = vadd.f32 %v1072_v48, %v719_v51  ;;  %v722_v56 = vadd.f32 %v1053_v52, %v681_v41 }
 0x12f   :  { %v763_v57 = vadd.f32 %v1075_v54, %v722_v56  ;;  %v766_v58 = vmax.f32 %v760_v55, 0.0 }
 0x131   :  { %v767_v59 = vmax.f32 %v763_v57, 0.0 }
 0x133   :  { %v768_v60 = vpack.c.bf16 %v767_v59, %v766_v58 }
 0x135   :  { %1102 = vmatmul.mubr.bf16.vlgmr.msra.gmra.mrb[8].mxu0 %v768_v60 }
 0x208   :  { %v874_v62 = vpop.f32.mrb[8].mxu0 }
 0x209   :  { %v875_v63 = vadd.f32 %v979_v61, %v874_v62  ;;  %v1103_v0 = vpop.f32.mrb[9].mxu0 }
 0x20a   :  { %v877_v1 = vpop.f32.mrb[10].mxu0 }
 0x20b   :  { %881 = vmax.xlane.f32.xlu0 %v875_v63  ;;  %v1104_v2 = vpop.f32.mrb[11].mxu0  ;;  %v878_v3 = vadd.f32 %v979_v61, %v877_v1 }
 0x20f   :  { %883 = vmax.xlane.f32.xlu0 %v878_v3 }
 0x298   :  { %v882_v4 = vpop.xlane.xlu0 %881 }
 0x299   :  { %v885_v5 = vsub.f32 %v875_v63, %v882_v4 }
 0x29b   :  { %v887_v6 = vmul.f32 1.442695, %v885_v5 }
 0x29c   :  { %v884_v7 = vpop.xlane.xlu0 %883 }
 0x29d   :  { %1182 = vpow2.f32 %v887_v6  ;;  %v886_v8 = vsub.f32 %v878_v3, %v884_v7 }
 0x29f   :  { %v889_v9 = vmul.f32 1.442695, %v886_v8 }
 0x2a1   :  { %1184 = vpow2.f32 %v889_v9 }
 0x2a7   :  { %v1183_v10 = vpop.eup %1182 }
 0x2a8   :  { %891 = vadd.xlane.f32.xlu1 %v1183_v10 }
 0x2ab   :  { %v1185_v11 = vpop.eup %1184 }
 0x2ac   :  { %893 = vadd.xlane.f32.xlu1 %v1185_v11 }
 0x335   :  { %v892_v12 = vpop.xlane.xlu1 %891 }
 0x336   :  { %1186 = vrcp.f32 %v892_v12 }
 0x339   :  { %v894_v13 = vpop.xlane.xlu1 %893 }
 0x33a   :  { %1188 = vrcp.f32 %v894_v13 }
 0x340   :  { %v1187_v14 = vpop.eup %1186 }
 0x341   :  { %v897_v15 = vmul.f32 %v1187_v14, %v1183_v10 }
 0x343   :  { %899 = vst [vmem:[%s1326_s5] sm:$0xff] %v897_v15 }
 0x344   :  { %v1189_v16 = vpop.eup %1188 }
 0x345   :  { %v898_v17 = vmul.f32 %v1189_v16, %v1185_v11 }
 0x347   :  { %900 = vst [vmem:[%s1326_s5 + $0x8] sm:$0xff] %v898_v17 }
 0x348   :  { %905 = vsyncpa [#allocation3], 1 }

</bundles_post_ra>
